<compile_context>
chip_gen: v7x
topology: tpu7x:2x2x1
jax: 0.10.0
libtpu: 0.0.40
codegen_flags: <defaults>
</compile_context>

<pallas_src>
import math

import numpy as np
import jax
import jax.numpy as jnp
from jax.experimental import pallas as pl
from jax.experimental.pallas import tpu as pltpu

# ---- model hyper-parameters (QuantumNet(in_dim=2, out_dim=3, hidden_dim=10)) ----
IN_DIM = 2
OUT_DIM = 3
HIDDEN = 10
N_QUBITS = 2
N_DEPTH = 1
N_LAYERS = 1
BATCH = 8
TWO_PI = 2.0 * math.pi

OH = OUT_DIM * HIDDEN          # 30 stacked hidden units (all heads)
Z_ROWS = 9 + IN_DIM            # 11: trig-bilinear basis (9) + raw features (2)
WA_ROWS = 8 + OH               # 38: [qcross(3); qlin(3); pad(2); layer1(30)]
SLAB_R, SLAB_C = 80, 32        # single packed constant slab (sublane-aligned bands)

# Default MXU precision (single-pass bf16) — HIGHEST dropped per perf review.
_MM = dict(preferred_element_type=jnp.float32)


# ----------------------------------------------------------------------------
# Parameter initialization (deterministic, synthetic — no checkpoint loading)
# ----------------------------------------------------------------------------
def init_params(key):
    keys = jax.random.split(key, 12)

    def unif(k, shape, bound):
        return jax.random.uniform(k, shape, jnp.float32, -bound, bound)

    params = dict(
        # TorchLayer quantum weights: uniform in [0, 2*pi)
        qw=jax.random.uniform(keys[0], (OUT_DIM, N_DEPTH + 1, N_LAYERS, N_QUBITS, 3),
                              jnp.float32, 0.0, TWO_PI),
        # QScalar: Linear(n_qubits, 1)
        ql_w=unif(keys[1], (OUT_DIM, N_QUBITS), 1.0 / math.sqrt(N_QUBITS)),
        ql_b=unif(keys[2], (OUT_DIM,), 1.0 / math.sqrt(N_QUBITS)),
        # CScalar: Linear(in,hid) -> ReLU -> Linear(hid,hid) -> ReLU -> Linear(hid,1)
        c_w1=unif(keys[3], (OUT_DIM, HIDDEN, IN_DIM), 1.0 / math.sqrt(IN_DIM)),
        c_b1=unif(keys[4], (OUT_DIM, HIDDEN), 1.0 / math.sqrt(IN_DIM)),
        c_w2=unif(keys[5], (OUT_DIM, HIDDEN, HIDDEN), 1.0 / math.sqrt(HIDDEN)),
        c_b2=unif(keys[6], (OUT_DIM, HIDDEN), 1.0 / math.sqrt(HIDDEN)),
        c_w3=unif(keys[7], (OUT_DIM, HIDDEN), 1.0 / math.sqrt(HIDDEN)),
        c_b3=unif(keys[8], (OUT_DIM,), 1.0 / math.sqrt(HIDDEN)),
        # lin_out: Linear(3, 1) per head; columns = [w_cross, w_q, w_c]
        lo_w=unif(keys[9], (OUT_DIM, 3), 1.0 / math.sqrt(3)),
        lo_b=unif(keys[10], (OUT_DIM,), 1.0 / math.sqrt(3)),
    )
    return params


# ----------------------------------------------------------------------------
# Quantum-circuit constants (host numpy, complex128, done ONCE — not per call):
#   StronglyEntanglingLayers with 1 layer on 2 wires (range = 1):
#     Rot(w[q]) on each wire q, then CNOT(0,1), CNOT(1,0).
#   psi0 = SEL(w[0]) |00>,  WB = SEL(w[1]).
# ----------------------------------------------------------------------------
def _rot(phi, theta, omega):
    c = np.cos(theta / 2.0)
    s = np.sin(theta / 2.0)
    return np.array(
        [[np.exp(-1j * (phi + omega) / 2.0) * c, -np.exp(1j * (phi - omega) / 2.0) * s],
         [np.exp(-1j * (phi - omega) / 2.0) * s, np.exp(1j * (phi + omega) / 2.0) * c]],
        dtype=np.complex128)


_CNOT01 = np.array([[1, 0, 0, 0], [0, 1, 0, 0], [0, 0, 0, 1], [0, 0, 1, 0]], np.complex128)
_CNOT10 = np.array([[1, 0, 0, 0], [0, 0, 0, 1], [0, 0, 1, 0], [0, 1, 0, 0]], np.complex128)


def _sel_layer(w2x3):
    # wire 0 is the most-significant bit of the statevector index.
    u = np.kron(_rot(*w2x3[0]), _rot(*w2x3[1]))
    return _CNOT10 @ _CNOT01 @ u


def build_circuit_constants(qw):
    qw = np.asarray(qw, np.float64)
    psi0 = np.zeros((OUT_DIM, 4), np.complex128)
    wb = np.zeros((OUT_DIM, 4, 4), np.complex128)
    e0 = np.array([1, 0, 0, 0], np.complex128)
    for i in range(OUT_DIM):
        psi0[i] = _sel_layer(qw[i, 0, 0]) @ e0
        wb[i] = _sel_layer(qw[i, 1, 0])
    return psi0, wb


def _fold_quantum_head(params):
    """Fold (SEL, RX-embedding, SEL, <Z>, Linear(2,1)) into exact R_i [3,3] with
       qout_i(x0,x1) = t0(x0)^T R_i t1(x1),  t(x) = [1, cos(2*pi*x), sin(2*pi*x)].
       The bilinear form is exact (|psi|^2 is quadratic in {cos(pi x), sin(pi x)}),
       so a 3x3-sample fit in float64 recovers R_i exactly (up to f64 roundoff)."""
    # Guard: the fold is only exact for this specific circuit shape.
    assert (N_QUBITS, N_DEPTH, N_LAYERS, IN_DIM) == (2, 1, 1, 2), \
        "exact trig-bilinear fold only valid for n_qubits=2, n_depth=1, n_layers=1, in_dim=2"
    qw = np.asarray(params["qw"], np.float64)
    ql_w = np.asarray(params["ql_w"], np.float64)
    ql_b = np.asarray(params["ql_b"], np.float64)
    psi0, wb = build_circuit_constants(qw)

    def qout_exact(i, x0, x1):
        h0, h1 = np.pi * x0, np.pi * x1          # RX angle = 2*pi*x  ->  half-angle pi*x
        rx0 = np.array([[np.cos(h0), -1j * np.sin(h0)], [-1j * np.sin(h0), np.cos(h0)]])
        rx1 = np.array([[np.cos(h1), -1j * np.sin(h1)], [-1j * np.sin(h1), np.cos(h1)]])
        psi = wb[i] @ (np.kron(rx0, rx1) @ psi0[i])
        p = np.abs(psi) ** 2
        z0 = p[0] + p[1] - p[2] - p[3]
        z1 = p[0] - p[1] + p[2] - p[3]
        return ql_w[i, 0] * z0 + ql_w[i, 1] * z1 + ql_b[i]

    xs = np.array([0.0, 1.0 / 3.0, 2.0 / 3.0])
    T = np.stack([np.ones(3), np.cos(TWO_PI * xs), np.sin(TWO_PI * xs)], axis=1)  # rows t(xs[a])
    Tinv = np.linalg.inv(T)
    rq = np.zeros((OUT_DIM, 9), np.float64)
    for i in range(OUT_DIM):
        Z = np.array([[qout_exact(i, xa, xb) for xb in xs] for xa in xs])  # Z = T R T^T
        R = Tinv @ Z @ Tinv.T
        rq[i] = R.reshape(9)                      # flat index 3*p + q  (p: x0-basis, q: x1-basis)
    return rq


# ----------------------------------------------------------------------------
# Host-side constant folding + packing into ONE slab (float64, done once).
#
# Slab layout (f32, [80, 32], all row-band starts are multiples of 8):
#   rows  0.. 2, cols 0.. 8 : lo_w[:,0] * R_i         (qcross weights)
#   rows  3.. 5, cols 0.. 8 : lo_w[:,1] * R_i         (qlin weights)
#   rows  8..37, col  0     : b1 (stacked)            (rides on z's ones-row)
#   rows  8..37, cols 9..10 : w1 (stacked [30, 2])
#   rows 40..69, cols 0..29 : w2 block-diagonal [30, 30]
#   rows 40..69, col  30    : b2 (stacked)
#   rows 72..74, cols 0..29 : w3 (row-sparse, raw)         -> cout
#   rows 75..77, cols 0..29 : lo_w[:,2] * w3 (row-sparse)  -> lo_w2*cout
#   rows 72..74, col  30    : b3
#   rows 75..77, col  30    : lo_w[:,2]*b3 + lo_b
# ----------------------------------------------------------------------------
def prepare_constants(params):
    c_w1 = np.asarray(params["c_w1"], np.float64)    # [OUT, H, IN]
    c_b1 = np.asarray(params["c_b1"], np.float64)    # [OUT, H]
    c_w2 = np.asarray(params["c_w2"], np.float64)    # [OUT, H, H]
    c_b2 = np.asarray(params["c_b2"], np.float64)    # [OUT, H]
    c_w3 = np.asarray(params["c_w3"], np.float64)    # [OUT, H]
    c_b3 = np.asarray(params["c_b3"], np.float64)    # [OUT]
    lo_w = np.asarray(params["lo_w"], np.float64)    # [OUT, 3]
    lo_b = np.asarray(params["lo_b"], np.float64)    # [OUT]

    rq = _fold_quantum_head(params)                  # [OUT, 9]

    slab = np.zeros((SLAB_R, SLAB_C), np.float64)
    # WA band (fused quantum heads + layer 1)
    slab[0:3, 0:9] = lo_w[:, 0:1] * rq
    slab[3:6, 0:9] = lo_w[:, 1:2] * rq
    slab[8:8 + OH, 0] = c_b1.reshape(OH)
    slab[8:8 + OH, 9:9 + IN_DIM] = c_w1.reshape(OH, IN_DIM)
    # W2 band (block-diagonal) + b2
    for i in range(OUT_DIM):
        slab[40 + i * HIDDEN:40 + (i + 1) * HIDDEN,
             i * HIDDEN:(i + 1) * HIDDEN] = c_w2[i]
    slab[40:40 + OH, 30] = c_b2.reshape(OH)
    # W3 band (raw + lin_out-scaled copies) + biases (lo_b folded in)
    for i in range(OUT_DIM):
        slab[72 + i, i * HIDDEN:(i + 1) * HIDDEN] = c_w3[i]
        slab[75 + i, i * HIDDEN:(i + 1) * HIDDEN] = lo_w[i, 2] * c_w3[i]
    slab[72:75, 30] = c_b3
    slab[75:78, 30] = lo_w[:, 2] * c_b3 + lo_b
    return jnp.asarray(slab, jnp.float32)


# ----------------------------------------------------------------------------
# Pallas kernel: whole QuantumNet forward, all heads fused, batch on lanes.
#   3 MXU matmuls + 2 ReLUs + 1 multiply-add epilogue per batch block.
# ----------------------------------------------------------------------------
def quantumnet_kernel(xt_ref,      # [IN, BB]   features on sublanes, batch on lanes
                      slab_ref,    # [80, 32]   packed constants (single resident DMA)
                      y_ref,       # [OUT, BB]  lane-dense output slab
                      z_scr):      # [11, BB]   VMEM scratch: fused-matmul operand
    xt = xt_ref[...]
    ang = TWO_PI * xt
    ca = jnp.cos(ang)
    sa = jnp.sin(ang)
    ca0, ca1 = ca[0:1, :], ca[1:2, :]
    sa0, sa1 = sa[0:1, :], sa[1:2, :]

    # z rows: [1, c1, s1, c0, c0*c1, c0*s1, s0, s0*c1, s0*s1, x0, x1]
    # (static row stores into a padded scratch — no sub-8-sublane concats)
    z_scr[0:1, :] = jnp.ones_like(ca0)
    z_scr[1:2, :] = ca1
    z_scr[2:3, :] = sa1
    z_scr[3:4, :] = ca0
    z_scr[4:5, :] = ca0 * ca1
    z_scr[5:6, :] = ca0 * sa1
    z_scr[6:7, :] = sa0
    z_scr[7:8, :] = sa0 * ca1
    z_scr[8:9, :] = sa0 * sa1
    z_scr[9:11, :] = xt
    z = z_scr[...]                                                    # [11, BB]

    # One fused MXU push: lin_out-scaled quantum heads + MLP layer 1 (b1 folded
    # into column 0, which contracts against z's ones-row).
    u = jnp.dot(slab_ref[0:WA_ROWS, 0:Z_ROWS], z, **_MM)              # [38, BB]
    qcross, qlin = u[0:3, :], u[3:6, :]
    h = jnp.maximum(u[8:8 + OH, :], 0.0)                              # [30, BB]

    # MLP layer 2 (all heads at once, block-diagonal weights) + ReLU.
    h = jnp.dot(slab_ref[40:40 + OH, 0:OH], h, **_MM) + slab_ref[40:40 + OH, 30:31]
    h = jnp.maximum(h, 0.0)

    # MLP layer 3: rows 0..2 -> raw cout, rows 3..5 -> lo_w2*cout + lo_b.
    c = jnp.dot(slab_ref[72:78, 0:OH], h, **_MM) + slab_ref[72:78, 30:31]   # [6, BB]

    # Epilogue: y = (lo_w0*q)*c + (lo_w1*q) + (lo_w2*c + lo_b)
    y_ref[...] = qcross * c[0:3, :] + qlin + c[3:6, :]


# ----------------------------------------------------------------------------
# Wrappers
# ----------------------------------------------------------------------------
def _pick_block(bp):
    """Lane block for padded batch bp (multiple of 128): prefer 256/512
       multiples (v6e/v7x 2x256 MXU) while keeping grid >= 2 once bp allows it
       so v7x's second TensorCore gets work."""
    if bp >= 1024 and bp % 512 == 0:
        return 512
    if bp >= 512 and bp % 256 == 0:
        return 256
    return 128


def quantumnet_forward_fm(xt, slab):
    """Feature-major fast path: xt [IN_DIM, Bp] (Bp % 128 == 0) -> [OUT_DIM, Bp].
       No wrapper-side transpose/pad HBM passes — use this end-to-end at large B."""
    Bp = xt.shape[1]
    assert Bp % 128 == 0, "pad the batch (lane) axis to a multiple of 128"
    blk = _pick_block(Bp)
    return pl.pallas_call(
        quantumnet_kernel,
        out_shape=jax.ShapeDtypeStruct((OUT_DIM, Bp), jnp.float32),
        grid=(Bp // blk,),
        in_specs=[
            pl.BlockSpec((IN_DIM, blk), lambda j: (0, j)),      # x^T, batch-blocked on lanes
            pl.BlockSpec((SLAB_R, SLAB_C), lambda j: (0, 0)),   # constant slab, resident
        ],
        out_specs=pl.BlockSpec((OUT_DIM, blk), lambda j: (0, j)),
        scratch_shapes=[pltpu.VMEM((Z_ROWS, blk), jnp.float32)],
        compiler_params=pltpu.CompilerParams(
            dimension_semantics=("parallel",)),                 # batch blocks shard across TCs
    )(xt, slab)


@jax.jit
def quantumnet_forward(x, slab):
    """Module-compatible interface: x [B, IN_DIM] -> y [B, OUT_DIM]."""
    B = x.shape[0]
    bp = ((B + 127) // 128) * 128
    xt = jnp.pad(x.astype(jnp.float32).T, ((0, 0), (0, bp - B)))
    yt = quantumnet_forward_fm(xt, slab)
    return yt[:, :B].T


# ----------------------------------------------------------------------------
# Pure numpy reference (complex-arithmetic statevector simulation) for checking
# ----------------------------------------------------------------------------
def ref_forward(x, params):
    x = np.asarray(x, np.float64)
    psi0, wb = build_circuit_constants(params["qw"])
    ql_w = np.asarray(params["ql_w"], np.float64)
    ql_b = np.asarray(params["ql_b"], np.float64)
    c_w1 = np.asarray(params["c_w1"], np.float64)
    c_b1 = np.asarray(params["c_b1"], np.float64)
    c_w2 = np.asarray(params["c_w2"], np.float64)
    c_b2 = np.asarray(params["c_b2"], np.float64)
    c_w3 = np.asarray(params["c_w3"], np.float64)
    c_b3 = np.asarray(params["c_b3"], np.float64)
    lo_w = np.asarray(params["lo_w"], np.float64)
    lo_b = np.asarray(params["lo_b"], np.float64)

    B = x.shape[0]
    xq = x * TWO_PI
    y = np.zeros((B, OUT_DIM))
    for i in range(OUT_DIM):
        zz = np.zeros((B, 2))
        for b in range(B):
            h0, h1 = xq[b, 0] / 2.0, xq[b, 1] / 2.0
            rx0 = np.array([[np.cos(h0), -1j * np.sin(h0)], [-1j * np.sin(h0), np.cos(h0)]])
            rx1 = np.array([[np.cos(h1), -1j * np.sin(h1)], [-1j * np.sin(h1), np.cos(h1)]])
            psi = wb[i] @ (np.kron(rx0, rx1) @ psi0[i])
            p = np.abs(psi) ** 2
            zz[b, 0] = p[0] + p[1] - p[2] - p[3]
            zz[b, 1] = p[0] - p[1] + p[2] - p[3]
        qout = zz @ ql_w[i] + ql_b[i]
        h = np.maximum(x @ c_w1[i].T + c_b1[i], 0.0)
        h = np.maximum(h @ c_w2[i].T + c_b2[i], 0.0)
        cout = h @ c_w3[i] + c_b3[i]
        feats = np.stack([qout * cout, qout, cout], axis=-1)
        y[:, i] = feats @ lo_w[i] + lo_b[i]
    return y


if __name__ == "__main__":
    key = jax.random.PRNGKey(0)
    pkey, xkey = jax.random.split(key)
    params = init_params(pkey)
    x = jax.random.normal(xkey, (BATCH, IN_DIM), jnp.float32)

    slab = prepare_constants(params)             # host folding + packing, done once
    y = quantumnet_forward(x, slab)
    y = jax.block_until_ready(y)

    y_ref = ref_forward(np.asarray(x), params)
    # Default (single-pass bf16) MXU precision per the perf review; tolerance
    # sized for bf16 rounding compounded through the 3 fused matmuls + q*c product.
    np.testing.assert_allclose(np.asarray(y), y_ref, rtol=3e-2, atol=3e-2)
    print("KERNEL_OK")
</pallas_src>

<mosaic_0001>
module attributes {stable_mosaic.version = 11 : i64} {
  func.func @quantumnet_kernel(%arg0: i32, %arg1: memref<2x128xf32, #tpu.memory_space<vmem>>, %arg2: memref<80x32xf32, #tpu.memory_space<vmem>>, %arg3: memref<3x128xf32, #tpu.memory_space<vmem>>, %arg4: memref<11x128xf32, #tpu.memory_space<vmem>>) attributes {dimension_semantics = [#tpu.dimension_semantics<parallel>], iteration_bounds = array<i64: 1>, scalar_prefetch = 0 : i64, scratch_operands = 1 : i64, tpu.core_type = #tpu.core_type<tc>, window_params = [{transform_indices = @transform_0, window_bounds = array<i64: 2, 128>}, {pipeline_mode = #tpu.pipeline_mode<synchronous>, transform_indices = @transform_1, window_bounds = array<i64: 80, 32>}, {transform_indices = @transform_2, window_bounds = array<i64: 3, 128>}]} {
    %c0 = arith.constant 0 : index
    %c0_0 = arith.constant 0 : index
    %0 = vector.load %arg1[%c0, %c0_0] : memref<2x128xf32, #tpu.memory_space<vmem>>, vector<2x128xf32>
    %cst = arith.constant 6.28318548 : f32
    %1 = vector.broadcast %cst : f32 to vector<2x128xf32>
    %2 = arith.mulf %1, %0 : vector<2x128xf32>
    %3 = math.cos %2 : vector<2x128xf32>
    %4 = math.sin %2 : vector<2x128xf32>
    %5 = vector.extract_strided_slice %3 {offsets = [0, 0], sizes = [1, 128], strides = [1, 1]} : vector<2x128xf32> to vector<1x128xf32>
    %6 = vector.extract_strided_slice %3 {offsets = [1, 0], sizes = [1, 128], strides = [1, 1]} : vector<2x128xf32> to vector<1x128xf32>
    %7 = vector.extract_strided_slice %4 {offsets = [0, 0], sizes = [1, 128], strides = [1, 1]} : vector<2x128xf32> to vector<1x128xf32>
    %8 = vector.extract_strided_slice %4 {offsets = [1, 0], sizes = [1, 128], strides = [1, 1]} : vector<2x128xf32> to vector<1x128xf32>
    %cst_1 = arith.constant 1.000000e+00 : f32
    %9 = vector.broadcast %cst_1 : f32 to vector<1x128xf32>
    %c0_2 = arith.constant 0 : index
    %c0_3 = arith.constant 0 : index
    %10 = vector.load %arg4[%c0_2, %c0_3] : memref<11x128xf32, #tpu.memory_space<vmem>>, vector<1x128xf32>
    tpu.vector_store %arg4[%c0_2, %c0_3], %9 {strides = array<i32>} : memref<11x128xf32, #tpu.memory_space<vmem>>, vector<1x128xf32>,
    %c1 = arith.constant 1 : index
    %c0_4 = arith.constant 0 : index
    %11 = vector.load %arg4[%c1, %c0_4] : memref<11x128xf32, #tpu.memory_space<vmem>>, vector<1x128xf32>
    tpu.vector_store %arg4[%c1, %c0_4], %6 {strides = array<i32>} : memref<11x128xf32, #tpu.memory_space<vmem>>, vector<1x128xf32>,
    %c2 = arith.constant 2 : index
    %c0_5 = arith.constant 0 : index
    %12 = vector.load %arg4[%c2, %c0_5] : memref<11x128xf32, #tpu.memory_space<vmem>>, vector<1x128xf32>
    tpu.vector_store %arg4[%c2, %c0_5], %8 {strides = array<i32>} : memref<11x128xf32, #tpu.memory_space<vmem>>, vector<1x128xf32>,
    %c3 = arith.constant 3 : index
    %c0_6 = arith.constant 0 : index
    %13 = vector.load %arg4[%c3, %c0_6] : memref<11x128xf32, #tpu.memory_space<vmem>>, vector<1x128xf32>
    tpu.vector_store %arg4[%c3, %c0_6], %5 {strides = array<i32>} : memref<11x128xf32, #tpu.memory_space<vmem>>, vector<1x128xf32>,
    %14 = arith.mulf %5, %6 : vector<1x128xf32>
    %c4 = arith.constant 4 : index
    %c0_7 = arith.constant 0 : index
    %15 = vector.load %arg4[%c4, %c0_7] : memref<11x128xf32, #tpu.memory_space<vmem>>, vector<1x128xf32>
    tpu.vector_store %arg4[%c4, %c0_7], %14 {strides = array<i32>} : memref<11x128xf32, #tpu.memory_space<vmem>>, vector<1x128xf32>,
    %16 = arith.mulf %5, %8 : vector<1x128xf32>
    %c5 = arith.constant 5 : index
    %c0_8 = arith.constant 0 : index
    %17 = vector.load %arg4[%c5, %c0_8] : memref<11x128xf32, #tpu.memory_space<vmem>>, vector<1x128xf32>
    tpu.vector_store %arg4[%c5, %c0_8], %16 {strides = array<i32>} : memref<11x128xf32, #tpu.memory_space<vmem>>, vector<1x128xf32>,
    %c6 = arith.constant 6 : index
    %c0_9 = arith.constant 0 : index
    %18 = vector.load %arg4[%c6, %c0_9] : memref<11x128xf32, #tpu.memory_space<vmem>>, vector<1x128xf32>
    tpu.vector_store %arg4[%c6, %c0_9], %7 {strides = array<i32>} : memref<11x128xf32, #tpu.memory_space<vmem>>, vector<1x128xf32>,
    %19 = arith.mulf %7, %6 : vector<1x128xf32>
    %c7 = arith.constant 7 : index
    %c0_10 = arith.constant 0 : index
    %20 = vector.load %arg4[%c7, %c0_10] : memref<11x128xf32, #tpu.memory_space<vmem>>, vector<1x128xf32>
    tpu.vector_store %arg4[%c7, %c0_10], %19 {strides = array<i32>} : memref<11x128xf32, #tpu.memory_space<vmem>>, vector<1x128xf32>,
    %21 = arith.mulf %7, %8 : vector<1x128xf32>
    %c8 = arith.constant 8 : index
    %c0_11 = arith.constant 0 : index
    %22 = vector.load %arg4[%c8, %c0_11] : memref<11x128xf32, #tpu.memory_space<vmem>>, vector<1x128xf32>
    tpu.vector_store %arg4[%c8, %c0_11], %21 {strides = array<i32>} : memref<11x128xf32, #tpu.memory_space<vmem>>, vector<1x128xf32>,
    %c9 = arith.constant 9 : index
    %c0_12 = arith.constant 0 : index
    %23 = vector.load %arg4[%c9, %c0_12] : memref<11x128xf32, #tpu.memory_space<vmem>>, vector<2x128xf32>
    tpu.vector_store %arg4[%c9, %c0_12], %0 {strides = array<i32>} : memref<11x128xf32, #tpu.memory_space<vmem>>, vector<2x128xf32>,
    %c0_13 = arith.constant 0 : index
    %c0_14 = arith.constant 0 : index
    %24 = vector.load %arg4[%c0_13, %c0_14] : memref<11x128xf32, #tpu.memory_space<vmem>>, vector<11x128xf32>
    %c0_15 = arith.constant 0 : index
    %c0_16 = arith.constant 0 : index
    %25 = vector.load %arg2[%c0_15, %c0_16] : memref<80x32xf32, #tpu.memory_space<vmem>>, vector<38x11xf32>
    %cst_17 = arith.constant dense<0.000000e+00> : vector<38x128xf32>
    %26 = tpu.matmul %25, %24, %cst_17 {dimension_numbers = #tpu.dot_dimension_numbers<[1], [0], [0], [1], [0, 0, 1, 1], [], []>} : vector<38x11xf32>, vector<11x128xf32>, vector<38x128xf32> -> vector<38x128xf32>
    %27 = vector.extract_strided_slice %26 {offsets = [0, 0], sizes = [3, 128], strides = [1, 1]} : vector<38x128xf32> to vector<3x128xf32>
    %28 = vector.extract_strided_slice %26 {offsets = [3, 0], sizes = [3, 128], strides = [1, 1]} : vector<38x128xf32> to vector<3x128xf32>
    %29 = vector.extract_strided_slice %26 {offsets = [8, 0], sizes = [30, 128], strides = [1, 1]} : vector<38x128xf32> to vector<30x128xf32>
    %cst_18 = arith.constant 0.000000e+00 : f32
    %30 = vector.broadcast %cst_18 : f32 to vector<30x128xf32>
    %31 = arith.maximumf %29, %30 : vector<30x128xf32>
    %c40 = arith.constant 40 : index
    %c0_19 = arith.constant 0 : index
    %32 = vector.load %arg2[%c40, %c0_19] : memref<80x32xf32, #tpu.memory_space<vmem>>, vector<30x30xf32>
    %cst_20 = arith.constant dense<0.000000e+00> : vector<30x128xf32>
    %33 = tpu.matmul %32, %31, %cst_20 {dimension_numbers = #tpu.dot_dimension_numbers<[1], [0], [0], [1], [0, 0, 1, 1], [], []>} : vector<30x30xf32>, vector<30x128xf32>, vector<30x128xf32> -> vector<30x128xf32>
    %c40_21 = arith.constant 40 : index
    %c30 = arith.constant 30 : index
    %34 = vector.load %arg2[%c40_21, %c30] : memref<80x32xf32, #tpu.memory_space<vmem>>, vector<30x1xf32>
    %35 = vector.broadcast %34 : vector<30x1xf32> to vector<30x128xf32>
    %36 = arith.addf %33, %35 : vector<30x128xf32>
    %cst_22 = arith.constant 0.000000e+00 : f32
    %37 = vector.broadcast %cst_22 : f32 to vector<30x128xf32>
    %38 = arith.maximumf %36, %37 : vector<30x128xf32>
    %c72 = arith.constant 72 : index
    %c0_23 = arith.constant 0 : index
    %39 = vector.load %arg2[%c72, %c0_23] : memref<80x32xf32, #tpu.memory_space<vmem>>, vector<6x30xf32>
    %cst_24 = arith.constant dense<0.000000e+00> : vector<6x128xf32>
    %40 = tpu.matmul %39, %38, %cst_24 {dimension_numbers = #tpu.dot_dimension_numbers<[1], [0], [0], [1], [0, 0, 1, 1], [], []>} : vector<6x30xf32>, vector<30x128xf32>, vector<6x128xf32> -> vector<6x128xf32>
    %c72_25 = arith.constant 72 : index
    %c30_26 = arith.constant 30 : index
    %41 = vector.load %arg2[%c72_25, %c30_26] : memref<80x32xf32, #tpu.memory_space<vmem>>, vector<6x1xf32>
    %42 = vector.broadcast %41 : vector<6x1xf32> to vector<6x128xf32>
    %43 = arith.addf %40, %42 : vector<6x128xf32>
    %44 = vector.extract_strided_slice %43 {offsets = [0, 0], sizes = [3, 128], strides = [1, 1]} : vector<6x128xf32> to vector<3x128xf32>
    %45 = arith.mulf %27, %44 : vector<3x128xf32>
    %46 = arith.addf %45, %28 : vector<3x128xf32>
    %47 = vector.extract_strided_slice %43 {offsets = [3, 0], sizes = [3, 128], strides = [1, 1]} : vector<6x128xf32> to vector<3x128xf32>
    %48 = arith.addf %46, %47 : vector<3x128xf32>
    %c0_27 = arith.constant 0 : index
    %c0_28 = arith.constant 0 : index
    %49 = vector.load %arg3[%c0_27, %c0_28] : memref<3x128xf32, #tpu.memory_space<vmem>>, vector<3x128xf32>
    tpu.vector_store %arg3[%c0_27, %c0_28], %48 {strides = array<i32>} : memref<3x128xf32, #tpu.memory_space<vmem>>, vector<3x128xf32>,
    return
  }
  func.func @transform_0(%arg0: i32) -> (i32, i32) {
    %c0_i32 = arith.constant 0 : i32
    %c0_i32_0 = arith.constant 0 : i32
    return %c0_i32, %arg0 : i32, i32
  }
  func.func @transform_1(%arg0: i32) -> (i32, i32) {
    %c0_i32 = arith.constant 0 : i32
    %c0_i32_0 = arith.constant 0 : i32
    %c0_i32_1 = arith.constant 0 : i32
    return %c0_i32, %c0_i32_0 : i32, i32
  }
  func.func @transform_2(%arg0: i32) -> (i32, i32) {
    %c0_i32 = arith.constant 0 : i32
    %c0_i32_0 = arith.constant 0 : i32
    return %c0_i32, %arg0 : i32, i32
  }
}

</mosaic_0001>

<bundles_post_ra>
// kernel: quantumnet_forward.1
= control target key start
LH: loop header
LB: loop body
LE: loop exit
PB: predicated region body
PF: predicated region fallthrough
CT: control target
= control target key end

     0   :  { %v710_v0 = vmov 0.0|0.0   ;;  %v711_v2 = vmov 1.0   ;;  %vm712_vm0 = vmmov 0   ;;  %v713_v5 = vmov 0.0   ;;  %s826_s0 = inlined_call_operand.vmem [shape: f32[2,128], index: 0, kind: input, shape index: {}]   ;;  %s827_s1 = inlined_call_operand.vmem [shape: f32[80,32], index: 1, kind: input, shape index: {}]   ;;  %s828_s2 = inlined_call_operand.vmem [shape: f32[3,128], index: 2, kind: output, shape index: {}]  }
   0x1   :  { %667 = vmatprep.subr.bf16.mxu0 %v710_v0  ;;  %v11_v1 = vld [vmem:[%s826_s0] sm:$0x3]  ;;  %220 = vst [vmem:[#allocation2] sm:$0x1] %v711_v2  ;;  %627 = vmatprep.mubr.msk.f32.mxu0 %vm712_vm0, %v713_v5  ;;  %v714_v16 = vmov 683565275  }
   0x2   :  { %v741_v3 = vmul.f32 6.2831855, %v11_v1  ;;  %239 = vst [vmem:[#allocation2 + $0x9] sm:$0x3] %v11_v1  ;;  %v715_v18 = vmov 2475754826  }
   0x3   :  { %v716_v20 = vmov 2131351028   ;;  %v717_v22 = vmov 2102212464   ;;  %v718_v24 = vmov 920167782  }
   0x4   :  { %v16_v4 = vand.u32 2139095040, %v741_v3  ;;  %v13_v7 = vand.u32 2147483647, %v741_v3  ;;  %v719_v31 = vmov 1326507024   ;;  %vm15_vm8 = vcmp.lt.s32.totalorder %v741_v3, 0 }
   0x6   :  { %v17_v6 = vshrl.u32 %v16_v4, 23  ;;  %v20_v10 = vand.u32 8388607, %v13_v7  ;;  %vm14_vm9 = vcmp.le.f32.partialorder %v13_v7, 0.7853982 }
   0x8   :  { %v582_v8 = vadd.s32 4294967169, %v17_v6  ;;  %v21_v13 = vor.u32 8388608, %v20_v10 }
   0xa   :  { %v23_v9 = vadd.s32 1, %v582_v8  ;;  %v61_v33 = vshll.u32 %v21_v13, 8 }
   0xc   :  { %vm24_vm1 = vcmp.gt.s32.totalorder %v23_v9, 0 }
   0xd   :  { %v25_v11 = vsel %vm24_vm1, %v23_v9, 0  ;;  %vm105_vm1 = vweird.f32 %v741_v3 }
   0xe   :  { %v27_v12 = vand.u32 31, %v25_v11  ;;  %v26_v14 = vshrl.u32 %v25_v11, 5 }
  0x10   :  { %v28_v15 = vsub.s32 32, %v27_v12  ;;  %v30_v17 = vshll.u32 %v714_v16, %v27_v12  ;;  %v33_v19 = vshll.u32 %v715_v18, %v27_v12  ;;  %v36_v21 = vshll.u32 %v716_v20, %v27_v12 }
  0x11   :  { %v39_v23 = vshll.u32 %v717_v22, %v27_v12  ;;  %v42_v25 = vshll.u32 %v718_v24, %v27_v12  ;;  %vm45_vm2 = vcmp.lt.s32.totalorder %v26_v14, 1  ;;  %vm48_vm3 = vcmp.lt.s32.totalorder %v26_v14, 4 }
  0x12   :  { %v29_v26 = vshrl.u32 %v714_v16, %v28_v15  ;;  %v31_v27 = vshrl.u32 %v715_v18, %v28_v15  ;;  %v34_v28 = vshrl.u32 %v716_v20, %v28_v15  ;;  %v37_v29 = vshrl.u32 %v717_v22, %v28_v15 }
  0x13   :  { %v40_v30 = vshrl.u32 %v718_v24, %v28_v15  ;;  %v43_v32 = vshrl.u32 %v719_v31, %v28_v15  ;;  %vm46_vm4 = vcmp.lt.s32.totalorder %v26_v14, 2  ;;  %vm47_vm5 = vcmp.lt.s32.totalorder %v26_v14, 3 }
  0x14   :  { %v32_v34 = vor.u32 %v31_v27, %v30_v17  ;;  %v35_v35 = vor.u32 %v34_v28, %v33_v19  ;;  %v38_v36 = vor.u32 %v37_v29, %v36_v21 }
  0x15   :  { %v41_v37 = vor.u32 %v40_v30, %v39_v23  ;;  %v44_v38 = vor.u32 %v43_v32, %v42_v25 }
  0x16   :  { %v49_v39 = vsel %vm45_vm2, %v29_v26, %v32_v34  ;;  %v50_v40 = vsel %vm48_vm3, %v38_v36, 2102212464  ;;  %v53_v41 = vsel %vm45_vm2, %v32_v34, %v35_v35  ;;  %v57_v42 = vsel %vm45_vm2, %v35_v35, %v38_v36 }
  0x17   :  { %v51_v43 = vsel %vm47_vm5, %v35_v35, %v50_v40  ;;  %v54_v44 = vsel %vm48_vm3, %v41_v37, 920167782  ;;  %v58_v45 = vsel %vm48_vm3, %v44_v38, 1326507024  ;;  %vm263_vm2 = vcmask 1042432  }
  0x18   :  { %v55_v46 = vsel %vm47_vm5, %v38_v36, %v54_v44  ;;  %v59_v47 = vsel %vm47_vm5, %v41_v37, %v58_v45  ;;  %v52_v48 = vsel %vm46_vm4, %v49_v39, %v51_v43  ;;  %vm720_vm3 = vmmov 1  }
  0x19   :  { %v56_v49 = vsel %vm46_vm4, %v53_v41, %v55_v46  ;;  %v60_v50 = vsel %vm46_vm4, %v57_v42, %v59_v47  ;;  %v68_v55 = vmul.u32 %v61_v33, %v52_v48  ;;  %vm669_vm4 = vmpackc.low %vm263_vm2, %vm720_vm3  ;;  %v242_v48 = vld [vmem:[%s827_s1] sm:$0xff]  ;;  %vm247_vm5 = vcmask 89088  }
  0x1a   :  { %v749_v51 = vmul.u32.u64.low %v61_v33, %v60_v50  ;;  %v750_v52 = vmul.u32.u64.high %v61_v33, %v60_v50, %v749_v51  ;;  %v752_v53 = vmul.u32.u64.low %v61_v33, %v56_v49  ;;  %v753_v54 = vmul.u32.u64.high %v61_v33, %v56_v49, %v752_v53  ;;  %v243_v49 = vld [vmem:[%s827_s1 + $0x8] sm:$0xff]  ;;  %v244_v50 = vld [vmem:[%s827_s1 + $0x10] sm:$0xff] }
  0x1b   :  { %v245_v51 = vld [vmem:[%s827_s1 + $0x18] sm:$0xff] }
  0x1c   :  { %vm70_vm6 = vc.u32 %v750_v52, %v752_v53  ;;  %v71_v56 = vadd.s32 1, %v753_v54  ;;  %v69_v6 = vadd.s32 %v752_v53, %v750_v52  ;;  %v246_v52 = vld [vmem:[%s827_s1 + $0x20] sm:$0x3f]  ;;  %v361_v53 = vld [vmem:[%s827_s1 + $0x28] sm:$0xff] }
  0x1e   :  { %v72_v57 = vsel %vm70_vm6, %v71_v56, %v753_v54  ;;  %vm385_vm6 = vcmask 244736   ;;  %v363_v54 = vld [vmem:[%s827_s1 + $0x38] sm:$0xff]  ;;  %v362_v56 = vld [vmem:[%s827_s1 + $0x30] sm:$0xff] }
  0x1f   :  { %v73_v58 = vadd.s32 %v72_v57, %v68_v55  ;;  %650 = vmatprep.mubr.msk.f32.mxu1 %vm385_vm6, %v361_v53  ;;  %v721_v55 = vmov 30   ;;  %v364_v57 = vld [vmem:[%s827_s1 + $0x40] sm:$0x3f] }
  0x20   :  { %704 = vset.pattern.permute.xlu0 %v721_v55  ;;  %705 = vset.pattern.permute.xlu1 %v721_v55 }
  0x21   :  { %v74_v59 = vadd.s32 536870912, %v73_v58  ;;  %367 = vperm.xlu0 %704, %v361_v53   ;;  %377 = vperm.xlu1 %705, %v363_v54  }
  0x23   :  { %v75_v60 = vshrl.u32 %v74_v59, 30 }
  0x25   :  { %v76_v61 = vshll.u32 %v75_v60, 30  ;;  %v99_v19 = vsub.s32 4, %v75_v60  ;;  %372 = vperm.xlu0 %704, %v362_v56   ;;  %382 = vperm.xlu1 %705, %v364_v57  }
  0x27   :  { %v77_v62 = vsub.s32 %v73_v58, %v76_v61  ;;  %v100_v22 = vsel %vm15_vm8, %v99_v19, %v75_v60  ;;  %v487_v58 = vld [vmem:[%s827_s1 + $0x48] sm:$0x3f] }
  0x28   :  { %v102_v25 = vsel %vm14_vm9, 0, %v100_v22 }
  0x29   :  { %v79_v63 = vsub.s32 0, %v77_v62  ;;  %v209_v26 = vadd.s32 3, %v102_v25  ;;  %v106_v27 = vand.u32 3, %v102_v25  ;;  %490 = vperm.xlu0 %704, %v487_v58  }
  0x2b   :  { %v583_v1 = vmin.u32 %v79_v63, %v77_v62  ;;  %v210_v28 = vand.u32 3, %v209_v26  ;;  %vm111_vm10 = vcmp.eq.s32.totalorder %v106_v27, 2  ;;  %vm108_vm12 = vcmp.eq.s32.totalorder %v106_v27, 0 }
  0x2c   :  { %vm107_vm14 = vcmp.lt.s32.totalorder %v106_v27, 2 }
  0x2d   :  { %v81_v2 = vclz %v583_v1  ;;  %vm215_vm11 = vcmp.eq.s32.totalorder %v210_v28, 2  ;;  %vm212_vm13 = vcmp.eq.s32.totalorder %v210_v28, 0  ;;  %vm211_vm15 = vcmp.lt.s32.totalorder %v210_v28, 2 }
  0x2f   :  { %v584_v4 = vadd.s32 4294967294, %v81_v2 }
  0x31   :  { %vm585_vm7 = vcmp.lt.s32.totalorder %v584_v4, 0 }
  0x32   :  { %v84_v8 = vsel %vm585_vm7, 0, %v584_v4  ;;  %vm394_vm7 = vcmask 1045504  }
  0x33   :  { %v85_v9 = vsub.s32 32, %v84_v8  ;;  %v86_v10 = vshll.u32 %v77_v62, %v84_v8  ;;  %v89_v11 = vsub.s32 4294967266, %v84_v8 }
  0x35   :  { %v87_v12 = vshrl.u32 %v69_v6, %v85_v9  ;;  %v90_v13 = vadd.s32 127, %v89_v11 }
  0x37   :  { %v88_v14 = vor.u32 %v87_v12, %v86_v10  ;;  %v91_v15 = vshll.u32 %v90_v13, 23 }
  0x39   :  { %v92_v16 = vor.u32 4788187, %v91_v15  ;;  %v95_v17 = vcvt.s32.f32 %v88_v14 }
  0x3b   :  { %v93_v18 = vand.u32 2147483647, %v92_v16 }
  0x3d   :  { %v96_v20 = vmul.f32 %v95_v17, %v93_v18 }
  0x3f   :  { %v97_v21 = vxor.u32 2147483648, %v96_v20 }
  0x41   :  { %v98_v23 = vsel %vm15_vm8, %v97_v21, %v96_v20  ;;  %vm805_vm8 = vmpackc.low %vm394_vm7, %vm720_vm3 }
  0x42   :  { %v101_v24 = vsel %vm14_vm9, %v741_v3, %v98_v23 }
  0x43   :  { %706 = vcosq.f32 %v101_v24 }
  0x44   :  { %708 = vsinq.f32 %v101_v24 }
  0x4d   :  { %v707_v29 = vpop.eup %706 }
  0x4e   :  { %v709_v30 = vpop.eup %708  ;;  %v112_v31 = vxor.u32 2147483648, %v707_v29 }
  0x4f   :  { %v109_v7 = vxor.u32 2147483648, %v709_v30 }
  0x50   :  { %v113_v32 = vsel %vm111_vm10, %v112_v31, %v709_v30  ;;  %v217_v33 = vsel %vm215_vm11, %v112_v31, %v709_v30 }
  0x51   :  { %v110_v34 = vsel %vm108_vm12, %v707_v29, %v109_v7  ;;  %v214_v35 = vsel %vm212_vm13, %v707_v29, %v109_v7 }
  0x52   :  { %v114_v36 = vsel %vm107_vm14, %v110_v34, %v113_v32  ;;  %v218_v37 = vsel %vm211_vm15, %v214_v35, %v217_v33 }
  0x53   :  { %v115_v38 = vsel %vm105_vm1, nan, %v114_v36  ;;  %v219_v39 = vsel %vm105_vm1, nan, %v218_v37 }
  0x54   :  { %221 = vst [vmem:[#allocation2] sm:$0x2] %v115_v38  ;;  %222 = vst [vmem:[#allocation2 + $0x1] sm:$0x2] %v219_v39  ;;  %v225_v40 = vrot.slane %v115_v38, 1  ;;  %v230_v41 = vrot.slane %v219_v39, 1 }
  0x55   :  { %223 = vst [vmem:[#allocation2 + $0x3] sm:$0x1] %v115_v38  ;;  %234 = vst [vmem:[#allocation2 + $0x6] sm:$0x1] %v219_v39 }
  0x56   :  { %v227_v42 = vmul.f32 %v225_v40, %v115_v38  ;;  %v232_v43 = vmul.f32 %v230_v41, %v115_v38  ;;  %v235_v44 = vmul.f32 %v225_v40, %v219_v39  ;;  %v237_v45 = vmul.f32 %v230_v41, %v219_v39 }
  0x58   :  { %228 = vst [vmem:[#allocation2 + $0x4] sm:$0x1] %v227_v42  ;;  %233 = vst [vmem:[#allocation2 + $0x5] sm:$0x1] %v232_v43 }
  0x59   :  { %236 = vst [vmem:[#allocation2 + $0x7] sm:$0x1] %v235_v44  ;;  %238 = vst [vmem:[#allocation2 + $0x8] sm:$0x1] %v237_v45 }
  0x60   :  { %v240_v3 = vld [vmem:[#allocation2] sm:$0xff]  ;;  %v241_v46 = vld [vmem:[#allocation2 + $0x8] sm:$0x7] }
  0x61   :  { %v668_v47 = vpack.c.bf16 %v241_v46, %v240_v3 }
  0x63   :  { %670 = vmatpush3.bf16.msk.msra.mxu0 %vm669_vm4, %v668_v47 }
  0x66   :  { %628 = vmatmul.mubr.msk.f32.vlgmr.msra.gmra.mrb[0].mxu0 %vm247_vm5, %v242_v48 }
  0x67   :  { %630 = vmatprep.mubr.msk.f32.mxu0 %vm712_vm0, %v713_v5 }
  0x6a   :  { %631 = vmatmul.mubr.msk.f32.gmra.mrb[2].mxu0 %vm247_vm5, %v243_v49 }
  0x6b   :  { %633 = vmatprep.mubr.msk.f32.mxu0 %vm712_vm0, %v713_v5 }
  0x6e   :  { %634 = vmatmul.mubr.msk.f32.gmra.mrb[4].mxu0 %vm247_vm5, %v244_v50 }
  0x6f   :  { %636 = vmatprep.mubr.msk.f32.mxu0 %vm712_vm0, %v713_v5 }
  0x72   :  { %637 = vmatmul.mubr.msk.f32.gmra.mrb[6].mxu0 %vm247_vm5, %v245_v51 }
  0x73   :  { %639 = vmatprep.mubr.msk.f32.mxu0 %vm712_vm0, %v713_v5 }
  0x76   :  { %640 = vmatmul.mubr.msk.f32.gmra.mrb[8].mxu0 %vm247_vm5, %v246_v52 }
  0xa0   :  { %v368_v16 = vpop.permute.xlu0 %367  ;;  %v378_v17 = vpop.permute.xlu1 %377 }
  0xa4   :  { %v373_v18 = vpop.permute.xlu0 %372  ;;  %v383_v24 = vpop.permute.xlu1 %382 }
  0xa8   :  { %v491_v32 = vpop.permute.xlu0 %490 }
 0x139   :  { %v333_v59 = vpop.f32.mrb[0].mxu0 }
 0x13a   :  { %v629_v60 = vpop.f32.mrb[1].mxu0  ;;  %v570_v36 = vrot.slane %v333_v59, 3 }
 0x13d   :  { %v338_v61 = vpop.f32.mrb[2].mxu0 }
 0x13e   :  { %v632_v62 = vpop.f32.mrb[3].mxu0  ;;  %v357_v1 = vmax.f32 %v338_v61, 0.0 }
 0x141   :  { %v343_v63 = vpop.f32.mrb[4].mxu0 }
 0x142   :  { %v358_v2 = vmax.f32 %v343_v63, 0.0  ;;  %v635_v4 = vpop.f32.mrb[5].mxu0 }
 0x144   :  { %v671_v6 = vpack.c.bf16 %v358_v2, %v357_v1 }
 0x145   :  { %v348_v8 = vpop.f32.mrb[6].mxu0 }
 0x146   :  { %v638_v9 = vpop.f32.mrb[7].mxu0  ;;  %672 = vmatprep.subr.bf16.mxu1 %v671_v6  ;;  %v359_v11 = vmax.f32 %v348_v8, 0.0 }
 0x147   :  { %674 = vmatpush3.bf16.msra.mxu1 %v671_v6 }
 0x149   :  { %v353_v10 = vpop.f32.mrb[8].mxu0 }
 0x14a   :  { %v360_v12 = vmax.f32 %v353_v10, 0.0  ;;  %v641_v13 = vpop.f32.mrb[9].mxu0 }
 0x14c   :  { %v675_v15 = vpack.c.bf16 %v360_v12, %v359_v11 }
 0x14e   :  { %677 = vmatprep.subr.msk.bf16.mxu1 %vm805_vm8, %v675_v15 }
 0x14f   :  { %680 = vmatpush3.bf16.msk.msra.mxu1 %vm805_vm8, %v675_v15 }
 0x150   :  { %681 = vmatprep.subr.bf16.mxu1 %v710_v0 }
 0x152   :  { %651 = vmatmul.mubr.msk.f32.vlgmr.msra.gmra.mrb[0].mxu1 %vm385_vm6, %v362_v56 }
 0x153   :  { %653 = vmatprep.mubr.msk.f32.mxu1 %vm385_vm6, %v363_v54 }
 0x156   :  { %654 = vmatmul.mubr.msk.f32.gmra.mrb[2].mxu1 %vm385_vm6, %v364_v57 }
 0x157   :  { %664 = vmatprep.mubr.msk.f32.mxu1 %vm712_vm0, %v713_v5 }
 0x225   :  { %v652_v19 = vpop.f32.mrb[0].mxu1 }
 0x226   :  { %v470_v20 = vadd.f32 %v652_v19, %v373_v18  ;;  %v464_v21 = vpop.f32.mrb[1].mxu1 }
 0x227   :  { %v465_v22 = vadd.f32 %v464_v21, %v368_v16 }
 0x228   :  { %v484_v23 = vmax.f32 %v470_v20, 0.0 }
 0x229   :  { %v483_v25 = vmax.f32 %v465_v22, 0.0  ;;  %v655_v26 = vpop.f32.mrb[2].mxu1 }
 0x22a   :  { %v480_v27 = vadd.f32 %v655_v26, %v383_v24  ;;  %v474_v28 = vpop.f32.mrb[3].mxu1 }
 0x22b   :  { %v682_v29 = vpack.c.bf16 %v484_v23, %v483_v25  ;;  %v475_v30 = vadd.f32 %v474_v28, %v378_v17 }
 0x22c   :  { %v486_v31 = vmax.f32 %v480_v27, 0.0 }
 0x22d   :  { %v485_v7 = vmax.f32 %v475_v30, 0.0  ;;  %683 = vmatpush3.bf16.msra.mxu1 %v682_v29 }
 0x22e   :  { %684 = vmatprep.subr.bf16.mxu1 %v710_v0 }
 0x22f   :  { %v685_v5 = vpack.c.bf16 %v486_v31, %v485_v7 }
 0x231   :  { %687 = vmatpush3.bf16.msk.msra.mxu1 %vm805_vm8, %v685_v5 }
 0x234   :  { %665 = vmatmul.mubr.msk.f32.vlgmr.msra.gmra.mrb[4].mxu1 %vm385_vm6, %v487_v58 }
 0x307   :  { %v564_v33 = vpop.f32.mrb[4].mxu1 }
 0x308   :  { %v565_v34 = vadd.f32 %v564_v33, %v491_v32  ;;  %v666_v35 = vpop.f32.mrb[5].mxu1 }
 0x30a   :  { %v568_v37 = vmul.f32 %v565_v34, %v333_v59  ;;  %v574_v39 = vrot.slane %v565_v34, 3 }
 0x30c   :  { %v572_v38 = vadd.f32 %v570_v36, %v568_v37 }
 0x30e   :  { %v576_v40 = vadd.f32 %v574_v39, %v572_v38 }
 0x310   :  { %577 = vst [vmem:[%s828_s2] sm:$0x7] %v576_v40 }

</bundles_post_ra>
